<compile_context>
chip_gen: v7x
topology: tpu7x:2x2x1
jax: 0.10.0
libtpu: 0.0.40
codegen_flags: <defaults>
</compile_context>

<pallas_src>
import jax
import jax.numpy as jnp
from jax.experimental import pallas as pl
from jax.experimental.pallas import tpu as pltpu


def _shortcut_conv3x3_kernel(x_ref, ht_ref, hb_ref, w_ref, o_ref, xpad_ref):
    """out = x + conv3x3_same(x) + bias for NB image row-blocks, fused.

    x_ref    : (NB, 1, C, TB*W)  lane-dense flattened row block (TB rows)
    ht_ref   : (NB, 1, C, W)     row just above the block (zeros at image top)
    hb_ref   : (NB, 1, C, W)     row just below the block (zeros at image bottom)
    w_ref    : (C, 9*C + 1)      fused weight slab [tap-major | bias column]
    o_ref    : (NB, 1, C, TB*W)  output row block
    xpad_ref : (C, (TB+2)*W + 2) scratch: halo-extended strip + 1-lane guards
    """
    NB, _, C, L = x_ref.shape
    W = ht_ref.shape[-1]

    # Column-validity masks (depend only on dx); computed once per grid step.
    ww = jax.lax.broadcasted_iota(jnp.int32, (1, L), 1) % W
    left_ok = ww >= 1            # reading column w-1 stays inside the image
    right_ok = ww < W - 1        # reading column w+1 stays inside the image

    ones_row = jnp.ones((1, L), dtype=x_ref.dtype)
    zcol = jnp.zeros((C, 1), dtype=x_ref.dtype)

    for g in range(NB):
        xi = x_ref[g, 0]                                    # (C, L)

        # Halo-extended strip: [guard | top halo | TB body rows | bottom halo | guard].
        xpad_ref[:, 0:1] = zcol
        xpad_ref[:, 1:1 + W] = ht_ref[g, 0]
        xpad_ref[:, 1 + W:1 + W + L] = xi
        xpad_ref[:, 1 + W + L:1 + 2 * W + L] = hb_ref[g, 0]
        xpad_ref[:, 1 + 2 * W + L:2 + 2 * W + L] = zcol

        # 9 conv taps = static lane-offset loads of the strip (vld slot, no
        # XLU rolls); row halos come for free from the strip, so only the two
        # column masks are applied (to the dx = -1 / +1 taps).
        taps = []
        for dy in (-1, 0, 1):
            for dx in (-1, 0, 1):
                s = 1 + (1 + dy) * W + dx
                t = xpad_ref[:, s:s + L]
                if dx == -1:
                    t = jnp.where(left_ok, t, jnp.zeros_like(t))
                elif dx == 1:
                    t = jnp.where(right_ok, t, jnp.zeros_like(t))
                taps.append(t)
        taps.append(ones_row)                               # bias row
        stack = jnp.concatenate(taps, axis=0)               # (9C+1, L)

        # Single fused MXU matmul: all 9 taps + bias in one K = 9C+1 contraction.
        conv = jnp.dot(w_ref[...], stack, preferred_element_type=jnp.float32)
        # Residual path of ShortcutBlock: exact f32 VPU add.
        o_ref[g, 0] = (conv + xi.astype(jnp.float32)).astype(o_ref.dtype)


def _choose_tiling(N, C, H, W, itemsize):
    """Pick (rows_per_block, images_per_step).

    Whole images when they are small; otherwise ~4 MiB row blocks so that the
    double-buffered in + out blocks stay well under the 32 MiB scoped-VMEM
    default (v7x-safe; v5e/v6e have more headroom and tolerate larger blocks).
    """
    img_bytes = C * H * W * itemsize
    if img_bytes <= 8 * 1024 * 1024:
        tb = H
    else:
        tb = max(1, (4 * 1024 * 1024) // (C * W * itemsize))
        tb = min(tb, H)
        while H % tb:
            tb -= 1
    blk_bytes = C * tb * W * itemsize
    nb = max(1, min(N, (4 * 1024 * 1024) // max(blk_bytes, 1)))
    while N % nb:
        nb -= 1
    return tb, nb


def shortcut_block_nchw(x_nchw, w_oihw, bias, *, rows_per_block=None,
                        images_per_step=None):
    """Public interface matching the PyTorch module: NCHW in / NCHW out."""
    N, C, H, W = x_nchw.shape
    dt = x_nchw.dtype

    tb, nb = _choose_tiling(N, C, H, W, jnp.dtype(dt).itemsize)
    if rows_per_block is not None:
        tb = rows_per_block
    if images_per_step is not None:
        nb = images_per_step
    assert H % tb == 0 and N % nb == 0
    R = H // tb
    L = tb * W

    # ---- host-side layout prep (all size-1 transposes are free at R == 1) ----
    # TODO(synk): for R > 1 the C<->R transpose costs one extra pass over x in
    # HBM; replace with element-offset BlockSpecs or a manual-DMA halo fetch.
    x5 = x_nchw.reshape(N, C, R, tb, W)
    x_blk = jnp.transpose(x5, (0, 2, 1, 3, 4)).reshape(N, R, C, L)

    # Thin halo slabs: the single row above / below each row block (zeros at
    # the image borders) -> ~2/tb extra HBM traffic instead of 3x neighbor reads.
    if R > 1:
        above = x_nchw[:, :, tb - 1:H - 1:tb, :]            # (N, C, R-1, W)
        below = x_nchw[:, :, tb::tb, :]                     # (N, C, R-1, W)
        zrow = jnp.zeros((N, C, 1, W), dt)
        ht = jnp.concatenate([zrow, above], axis=2)         # (N, C, R, W)
        hb = jnp.concatenate([below, zrow], axis=2)
    else:
        ht = jnp.zeros((N, C, 1, W), dt)
        hb = jnp.zeros((N, C, 1, W), dt)
    ht = jnp.transpose(ht, (0, 2, 1, 3))                    # (N, R, C, W)
    hb = jnp.transpose(hb, (0, 2, 1, 3))

    # Fused weight slab (C, 9C+1): column t*C+i holds W_oihw[:, i, ky, kx] with
    # t = ky*3 + kx; the last column is the bias (matched by a ones row).
    w_taps = jnp.transpose(w_oihw, (2, 3, 0, 1)).reshape(9, C, C)       # [t, o, i]
    w_slab = jnp.transpose(w_taps, (1, 0, 2)).reshape(C, 9 * C)         # [o, t*C+i]
    w_slab = jnp.concatenate(
        [w_slab, bias.reshape(C, 1).astype(w_slab.dtype)], axis=1)      # (C, 9C+1)

    out_blk = pl.pallas_call(
        _shortcut_conv3x3_kernel,
        out_shape=jax.ShapeDtypeStruct((N, R, C, L), dt),
        grid_spec=pltpu.PrefetchScalarGridSpec(
            num_scalar_prefetch=0,
            grid=(N // nb, R),
            in_specs=[
                pl.BlockSpec((nb, 1, C, L), lambda b, r: (b, r, 0, 0)),
                pl.BlockSpec((nb, 1, C, W), lambda b, r: (b, r, 0, 0)),
                pl.BlockSpec((nb, 1, C, W), lambda b, r: (b, r, 0, 0)),
                pl.BlockSpec((C, 9 * C + 1), lambda b, r: (0, 0)),
            ],
            out_specs=pl.BlockSpec((nb, 1, C, L), lambda b, r: (b, r, 0, 0)),
            scratch_shapes=[pltpu.VMEM((C, (tb + 2) * W + 2), dt)],
        ),
        compiler_params=pltpu.CompilerParams(
            # Both axes are independent: megacore / v7x's two TensorCores can
            # split either batch groups or row blocks (works even at N == 1).
            dimension_semantics=("parallel", "parallel"),
            vmem_limit_bytes=32 * 1024 * 1024,
        ),
    )(x_blk, ht, hb, w_slab)

    out5 = out_blk.reshape(N, R, C, tb, W)
    return jnp.transpose(out5, (0, 2, 1, 3, 4)).reshape(N, C, H, W)


def _reference_nchw(x_nchw, w_oihw, bias):
    """Pure-JAX reference: x + conv2d_3x3(x) + bias in NCHW, for verification."""
    conv = jax.lax.conv_general_dilated(
        x_nchw, w_oihw,
        window_strides=(1, 1), padding="SAME",
        dimension_numbers=("NCHW", "OIHW", "NCHW"),
    )
    return x_nchw + conv + bias.reshape(1, -1, 1, 1)


if __name__ == "__main__":
    N, C, H, W = 2, 4, 16, 16

    key = jax.random.PRNGKey(0)
    kx, kw, kb = jax.random.split(key, 3)
    x = jax.random.normal(kx, (N, C, H, W), dtype=jnp.float32)
    # Deterministic "submodule" parameters: 3x3 same-channel conv (OIHW) + bias.
    w = 0.1 * jax.random.normal(kw, (C, C, 3, 3), dtype=jnp.float32)
    b = 0.1 * jax.random.normal(kb, (C,), dtype=jnp.float32)

    out = shortcut_block_nchw(x, w, b)
    out = jax.block_until_ready(out)

    ref = _reference_nchw(x, w, b)
    assert out.shape == (N, C, H, W)
    assert jnp.allclose(out, ref, atol=2e-4, rtol=2e-4), "mismatch vs reference"

    print("KERNEL_OK")
</pallas_src>

<mosaic_0001>
module attributes {stable_mosaic.version = 11 : i64} {
  func.func @_shortcut_conv3x3_kernel(%arg0: i32, %arg1: i32, %arg2: memref<2x1x4x256xf32, #tpu.memory_space<vmem>>, %arg3: memref<2x1x4x16xf32, #tpu.memory_space<vmem>>, %arg4: memref<2x1x4x16xf32, #tpu.memory_space<vmem>>, %arg5: memref<4x37xf32, #tpu.memory_space<vmem>>, %arg6: memref<2x1x4x256xf32, #tpu.memory_space<vmem>>, %arg7: memref<4x290xf32, #tpu.memory_space<vmem>>) attributes {dimension_semantics = [#tpu.dimension_semantics<parallel>, #tpu.dimension_semantics<parallel>], iteration_bounds = array<i64: 1, 1>, scalar_prefetch = 0 : i64, scratch_operands = 1 : i64, tpu.core_type = #tpu.core_type<tc>, window_params = [{transform_indices = @transform_0, window_bounds = array<i64: 2, 1, 4, 256>}, {transform_indices = @transform_1, window_bounds = array<i64: 2, 1, 4, 16>}, {transform_indices = @transform_2, window_bounds = array<i64: 2, 1, 4, 16>}, {pipeline_mode = #tpu.pipeline_mode<synchronous>, transform_indices = @transform_3, window_bounds = array<i64: 4, 37>}, {transform_indices = @transform_4, window_bounds = array<i64: 2, 1, 4, 256>}]} {
    %0 = tpu.iota {dimensions = array<i32: 1>} : vector<1x256xi32>
    %c16_i32 = arith.constant 16 : i32
    %c0_i32 = arith.constant 0 : i32
    %1 = arith.cmpi eq, %c16_i32, %c0_i32 : i32
    %c1_i32 = arith.constant 1 : i32
    %2 = arith.select %1, %c1_i32, %c16_i32 : i32
    %3 = vector.broadcast %2 : i32 to vector<1x256xi32>
    %4 = arith.remsi %0, %3 : vector<1x256xi32>
    %c0_i32_0 = arith.constant 0 : i32
    %5 = vector.broadcast %c0_i32_0 : i32 to vector<1x256xi32>
    %6 = arith.cmpi ne, %4, %5 : vector<1x256xi32>
    %c0_i32_1 = arith.constant 0 : i32
    %7 = vector.broadcast %c0_i32_1 : i32 to vector<1x256xi32>
    %8 = arith.cmpi slt, %4, %7 : vector<1x256xi32>
    %c0_i32_2 = arith.constant 0 : i32
    %9 = arith.cmpi slt, %2, %c0_i32_2 : i32
    %10 = vector.broadcast %9 : i1 to vector<1x256xi1>
    %11 = vector.broadcast %10 : vector<1x256xi1> to vector<1x256xi1>
    %12 = arith.xori %8, %11 : vector<1x256xi1>
    %13 = arith.andi %12, %6 : vector<1x256xi1>
    %14 = vector.broadcast %2 : i32 to vector<1x256xi32>
    %15 = arith.addi %4, %14 : vector<1x256xi32>
    %16 = arith.select %13, %15, %4 : vector<1x256xi1>, vector<1x256xi32>
    %c1_i32_3 = arith.constant 1 : i32
    %17 = vector.broadcast %c1_i32_3 : i32 to vector<1x256xi32>
    %18 = arith.cmpi sge, %16, %17 : vector<1x256xi32>
    %c15_i32 = arith.constant 15 : i32
    %19 = vector.broadcast %c15_i32 : i32 to vector<1x256xi32>
    %20 = arith.cmpi slt, %16, %19 : vector<1x256xi32>
    %cst = arith.constant 1.000000e+00 : f32
    %21 = vector.broadcast %cst : f32 to vector<1x256xf32>
    %cst_4 = arith.constant 0.000000e+00 : f32
    %22 = vector.broadcast %cst_4 : f32 to vector<4x1xf32>
    %c0 = arith.constant 0 : index
    %c0_5 = arith.constant 0 : index
    %c0_6 = arith.constant 0 : index
    %c0_7 = arith.constant 0 : index
    %23 = vector.load %arg2[%c0, %c0_5, %c0_6, %c0_7] : memref<2x1x4x256xf32, #tpu.memory_space<vmem>>, vector<1x1x4x256xf32>
    %24 = vector.shape_cast %23 : vector<1x1x4x256xf32> to vector<4x256xf32>
    %c0_8 = arith.constant 0 : index
    %c0_9 = arith.constant 0 : index
    %25 = vector.load %arg7[%c0_8, %c0_9] : memref<4x290xf32, #tpu.memory_space<vmem>>, vector<4x1xf32>
    tpu.vector_store %arg7[%c0_8, %c0_9], %22 {strides = array<i32>} : memref<4x290xf32, #tpu.memory_space<vmem>>, vector<4x1xf32>,
    %c0_10 = arith.constant 0 : index
    %c0_11 = arith.constant 0 : index
    %c0_12 = arith.constant 0 : index
    %c0_13 = arith.constant 0 : index
    %26 = vector.load %arg3[%c0_10, %c0_11, %c0_12, %c0_13] : memref<2x1x4x16xf32, #tpu.memory_space<vmem>>, vector<1x1x4x16xf32>
    %27 = vector.shape_cast %26 : vector<1x1x4x16xf32> to vector<4x16xf32>
    %c0_14 = arith.constant 0 : index
    %c1 = arith.constant 1 : index
    %28 = vector.load %arg7[%c0_14, %c1] : memref<4x290xf32, #tpu.memory_space<vmem>>, vector<4x16xf32>
    tpu.vector_store %arg7[%c0_14, %c1], %27 {strides = array<i32>} : memref<4x290xf32, #tpu.memory_space<vmem>>, vector<4x16xf32>,
    %c0_15 = arith.constant 0 : index
    %c17 = arith.constant 17 : index
    %29 = vector.load %arg7[%c0_15, %c17] : memref<4x290xf32, #tpu.memory_space<vmem>>, vector<4x256xf32>
    tpu.vector_store %arg7[%c0_15, %c17], %24 {strides = array<i32>} : memref<4x290xf32, #tpu.memory_space<vmem>>, vector<4x256xf32>,
    %c0_16 = arith.constant 0 : index
    %c0_17 = arith.constant 0 : index
    %c0_18 = arith.constant 0 : index
    %c0_19 = arith.constant 0 : index
    %30 = vector.load %arg4[%c0_16, %c0_17, %c0_18, %c0_19] : memref<2x1x4x16xf32, #tpu.memory_space<vmem>>, vector<1x1x4x16xf32>
    %31 = vector.shape_cast %30 : vector<1x1x4x16xf32> to vector<4x16xf32>
    %c0_20 = arith.constant 0 : index
    %c273 = arith.constant 273 : index
    %32 = vector.load %arg7[%c0_20, %c273] : memref<4x290xf32, #tpu.memory_space<vmem>>, vector<4x16xf32>
    tpu.vector_store %arg7[%c0_20, %c273], %31 {strides = array<i32>} : memref<4x290xf32, #tpu.memory_space<vmem>>, vector<4x16xf32>,
    %c0_21 = arith.constant 0 : index
    %c289 = arith.constant 289 : index
    %33 = vector.load %arg7[%c0_21, %c289] : memref<4x290xf32, #tpu.memory_space<vmem>>, vector<4x1xf32>
    tpu.vector_store %arg7[%c0_21, %c289], %22 {strides = array<i32>} : memref<4x290xf32, #tpu.memory_space<vmem>>, vector<4x1xf32>,
    %c0_22 = arith.constant 0 : index
    %c0_23 = arith.constant 0 : index
    %34 = vector.load %arg7[%c0_22, %c0_23] : memref<4x290xf32, #tpu.memory_space<vmem>>, vector<4x256xf32>
    %cst_24 = arith.constant 0.000000e+00 : f32
    %35 = vector.broadcast %cst_24 : f32 to vector<4x256xf32>
    %36 = vector.shape_cast %18 : vector<1x256xi1> to vector<1x256xi1>
    %37 = vector.broadcast %36 : vector<1x256xi1> to vector<4x256xi1>
    %38 = arith.select %37, %34, %35 : vector<4x256xi1>, vector<4x256xf32>
    %c0_25 = arith.constant 0 : index
    %c1_26 = arith.constant 1 : index
    %39 = vector.load %arg7[%c0_25, %c1_26] : memref<4x290xf32, #tpu.memory_space<vmem>>, vector<4x256xf32>
    %c0_27 = arith.constant 0 : index
    %c2 = arith.constant 2 : index
    %40 = vector.load %arg7[%c0_27, %c2] : memref<4x290xf32, #tpu.memory_space<vmem>>, vector<4x256xf32>
    %cst_28 = arith.constant 0.000000e+00 : f32
    %41 = vector.broadcast %cst_28 : f32 to vector<4x256xf32>
    %42 = vector.shape_cast %20 : vector<1x256xi1> to vector<1x256xi1>
    %43 = vector.broadcast %42 : vector<1x256xi1> to vector<4x256xi1>
    %44 = arith.select %43, %40, %41 : vector<4x256xi1>, vector<4x256xf32>
    %c0_29 = arith.constant 0 : index
    %c16 = arith.constant 16 : index
    %45 = vector.load %arg7[%c0_29, %c16] : memref<4x290xf32, #tpu.memory_space<vmem>>, vector<4x256xf32>
    %cst_30 = arith.constant 0.000000e+00 : f32
    %46 = vector.broadcast %cst_30 : f32 to vector<4x256xf32>
    %47 = vector.shape_cast %18 : vector<1x256xi1> to vector<1x256xi1>
    %48 = vector.broadcast %47 : vector<1x256xi1> to vector<4x256xi1>
    %49 = arith.select %48, %45, %46 : vector<4x256xi1>, vector<4x256xf32>
    %c0_31 = arith.constant 0 : index
    %c17_32 = arith.constant 17 : index
    %50 = vector.load %arg7[%c0_31, %c17_32] : memref<4x290xf32, #tpu.memory_space<vmem>>, vector<4x256xf32>
    %c0_33 = arith.constant 0 : index
    %c18 = arith.constant 18 : index
    %51 = vector.load %arg7[%c0_33, %c18] : memref<4x290xf32, #tpu.memory_space<vmem>>, vector<4x256xf32>
    %cst_34 = arith.constant 0.000000e+00 : f32
    %52 = vector.broadcast %cst_34 : f32 to vector<4x256xf32>
    %53 = vector.shape_cast %20 : vector<1x256xi1> to vector<1x256xi1>
    %54 = vector.broadcast %53 : vector<1x256xi1> to vector<4x256xi1>
    %55 = arith.select %54, %51, %52 : vector<4x256xi1>, vector<4x256xf32>
    %c0_35 = arith.constant 0 : index
    %c32 = arith.constant 32 : index
    %56 = vector.load %arg7[%c0_35, %c32] : memref<4x290xf32, #tpu.memory_space<vmem>>, vector<4x256xf32>
    %cst_36 = arith.constant 0.000000e+00 : f32
    %57 = vector.broadcast %cst_36 : f32 to vector<4x256xf32>
    %58 = vector.shape_cast %18 : vector<1x256xi1> to vector<1x256xi1>
    %59 = vector.broadcast %58 : vector<1x256xi1> to vector<4x256xi1>
    %60 = arith.select %59, %56, %57 : vector<4x256xi1>, vector<4x256xf32>
    %c0_37 = arith.constant 0 : index
    %c33 = arith.constant 33 : index
    %61 = vector.load %arg7[%c0_37, %c33] : memref<4x290xf32, #tpu.memory_space<vmem>>, vector<4x256xf32>
    %c0_38 = arith.constant 0 : index
    %c34 = arith.constant 34 : index
    %62 = vector.load %arg7[%c0_38, %c34] : memref<4x290xf32, #tpu.memory_space<vmem>>, vector<4x256xf32>
    %cst_39 = arith.constant 0.000000e+00 : f32
    %63 = vector.broadcast %cst_39 : f32 to vector<4x256xf32>
    %64 = vector.shape_cast %20 : vector<1x256xi1> to vector<1x256xi1>
    %65 = vector.broadcast %64 : vector<1x256xi1> to vector<4x256xi1>
    %66 = arith.select %65, %62, %63 : vector<4x256xi1>, vector<4x256xf32>
    %67 = tpu.concatenate %38, %39, %44, %49, %50, %55, %60, %61, %66, %21 in 0 : vector<4x256xf32>, vector<4x256xf32>, vector<4x256xf32>, vector<4x256xf32>, vector<4x256xf32>, vector<4x256xf32>, vector<4x256xf32>, vector<4x256xf32>, vector<4x256xf32>, vector<1x256xf32> -> vector<37x256xf32>
    %c0_40 = arith.constant 0 : index
    %c0_41 = arith.constant 0 : index
    %68 = vector.load %arg5[%c0_40, %c0_41] : memref<4x37xf32, #tpu.memory_space<vmem>>, vector<4x37xf32>
    %cst_42 = arith.constant dense<0.000000e+00> : vector<4x256xf32>
    %69 = tpu.matmul %68, %67, %cst_42 {dimension_numbers = #tpu.dot_dimension_numbers<[1], [0], [0], [1], [0, 0, 1, 1], [], []>} : vector<4x37xf32>, vector<37x256xf32>, vector<4x256xf32> -> vector<4x256xf32>
    %70 = arith.addf %69, %24 : vector<4x256xf32>
    %c0_43 = arith.constant 0 : index
    %c0_44 = arith.constant 0 : index
    %c0_45 = arith.constant 0 : index
    %c0_46 = arith.constant 0 : index
    %71 = vector.load %arg6[%c0_43, %c0_44, %c0_45, %c0_46] : memref<2x1x4x256xf32, #tpu.memory_space<vmem>>, vector<1x1x4x256xf32>
    %72 = vector.shape_cast %71 : vector<1x1x4x256xf32> to vector<4x256xf32>
    %73 = vector.shape_cast %70 : vector<4x256xf32> to vector<1x1x4x256xf32>
    tpu.vector_store %arg6[%c0_43, %c0_44, %c0_45, %c0_46], %73 {strides = array<i32>} : memref<2x1x4x256xf32, #tpu.memory_space<vmem>>, vector<1x1x4x256xf32>,
    %c1_47 = arith.constant 1 : index
    %c0_48 = arith.constant 0 : index
    %c0_49 = arith.constant 0 : index
    %c0_50 = arith.constant 0 : index
    %74 = vector.load %arg2[%c1_47, %c0_48, %c0_49, %c0_50] : memref<2x1x4x256xf32, #tpu.memory_space<vmem>>, vector<1x1x4x256xf32>
    %75 = vector.shape_cast %74 : vector<1x1x4x256xf32> to vector<4x256xf32>
    %c0_51 = arith.constant 0 : index
    %c0_52 = arith.constant 0 : index
    %76 = vector.load %arg7[%c0_51, %c0_52] : memref<4x290xf32, #tpu.memory_space<vmem>>, vector<4x1xf32>
    tpu.vector_store %arg7[%c0_51, %c0_52], %22 {strides = array<i32>} : memref<4x290xf32, #tpu.memory_space<vmem>>, vector<4x1xf32>,
    %c1_53 = arith.constant 1 : index
    %c0_54 = arith.constant 0 : index
    %c0_55 = arith.constant 0 : index
    %c0_56 = arith.constant 0 : index
    %77 = vector.load %arg3[%c1_53, %c0_54, %c0_55, %c0_56] : memref<2x1x4x16xf32, #tpu.memory_space<vmem>>, vector<1x1x4x16xf32>
    %78 = vector.shape_cast %77 : vector<1x1x4x16xf32> to vector<4x16xf32>
    %c0_57 = arith.constant 0 : index
    %c1_58 = arith.constant 1 : index
    %79 = vector.load %arg7[%c0_57, %c1_58] : memref<4x290xf32, #tpu.memory_space<vmem>>, vector<4x16xf32>
    tpu.vector_store %arg7[%c0_57, %c1_58], %78 {strides = array<i32>} : memref<4x290xf32, #tpu.memory_space<vmem>>, vector<4x16xf32>,
    %c0_59 = arith.constant 0 : index
    %c17_60 = arith.constant 17 : index
    %80 = vector.load %arg7[%c0_59, %c17_60] : memref<4x290xf32, #tpu.memory_space<vmem>>, vector<4x256xf32>
    tpu.vector_store %arg7[%c0_59, %c17_60], %75 {strides = array<i32>} : memref<4x290xf32, #tpu.memory_space<vmem>>, vector<4x256xf32>,
    %c1_61 = arith.constant 1 : index
    %c0_62 = arith.constant 0 : index
    %c0_63 = arith.constant 0 : index
    %c0_64 = arith.constant 0 : index
    %81 = vector.load %arg4[%c1_61, %c0_62, %c0_63, %c0_64] : memref<2x1x4x16xf32, #tpu.memory_space<vmem>>, vector<1x1x4x16xf32>
    %82 = vector.shape_cast %81 : vector<1x1x4x16xf32> to vector<4x16xf32>
    %c0_65 = arith.constant 0 : index
    %c273_66 = arith.constant 273 : index
    %83 = vector.load %arg7[%c0_65, %c273_66] : memref<4x290xf32, #tpu.memory_space<vmem>>, vector<4x16xf32>
    tpu.vector_store %arg7[%c0_65, %c273_66], %82 {strides = array<i32>} : memref<4x290xf32, #tpu.memory_space<vmem>>, vector<4x16xf32>,
    %c0_67 = arith.constant 0 : index
    %c289_68 = arith.constant 289 : index
    %84 = vector.load %arg7[%c0_67, %c289_68] : memref<4x290xf32, #tpu.memory_space<vmem>>, vector<4x1xf32>
    tpu.vector_store %arg7[%c0_67, %c289_68], %22 {strides = array<i32>} : memref<4x290xf32, #tpu.memory_space<vmem>>, vector<4x1xf32>,
    %c0_69 = arith.constant 0 : index
    %c0_70 = arith.constant 0 : index
    %85 = vector.load %arg7[%c0_69, %c0_70] : memref<4x290xf32, #tpu.memory_space<vmem>>, vector<4x256xf32>
    %cst_71 = arith.constant 0.000000e+00 : f32
    %86 = vector.broadcast %cst_71 : f32 to vector<4x256xf32>
    %87 = vector.shape_cast %18 : vector<1x256xi1> to vector<1x256xi1>
    %88 = vector.broadcast %87 : vector<1x256xi1> to vector<4x256xi1>
    %89 = arith.select %88, %85, %86 : vector<4x256xi1>, vector<4x256xf32>
    %c0_72 = arith.constant 0 : index
    %c1_73 = arith.constant 1 : index
    %90 = vector.load %arg7[%c0_72, %c1_73] : memref<4x290xf32, #tpu.memory_space<vmem>>, vector<4x256xf32>
    %c0_74 = arith.constant 0 : index
    %c2_75 = arith.constant 2 : index
    %91 = vector.load %arg7[%c0_74, %c2_75] : memref<4x290xf32, #tpu.memory_space<vmem>>, vector<4x256xf32>
    %cst_76 = arith.constant 0.000000e+00 : f32
    %92 = vector.broadcast %cst_76 : f32 to vector<4x256xf32>
    %93 = vector.shape_cast %20 : vector<1x256xi1> to vector<1x256xi1>
    %94 = vector.broadcast %93 : vector<1x256xi1> to vector<4x256xi1>
    %95 = arith.select %94, %91, %92 : vector<4x256xi1>, vector<4x256xf32>
    %c0_77 = arith.constant 0 : index
    %c16_78 = arith.constant 16 : index
    %96 = vector.load %arg7[%c0_77, %c16_78] : memref<4x290xf32, #tpu.memory_space<vmem>>, vector<4x256xf32>
    %cst_79 = arith.constant 0.000000e+00 : f32
    %97 = vector.broadcast %cst_79 : f32 to vector<4x256xf32>
    %98 = vector.shape_cast %18 : vector<1x256xi1> to vector<1x256xi1>
    %99 = vector.broadcast %98 : vector<1x256xi1> to vector<4x256xi1>
    %100 = arith.select %99, %96, %97 : vector<4x256xi1>, vector<4x256xf32>
    %c0_80 = arith.constant 0 : index
    %c17_81 = arith.constant 17 : index
    %101 = vector.load %arg7[%c0_80, %c17_81] : memref<4x290xf32, #tpu.memory_space<vmem>>, vector<4x256xf32>
    %c0_82 = arith.constant 0 : index
    %c18_83 = arith.constant 18 : index
    %102 = vector.load %arg7[%c0_82, %c18_83] : memref<4x290xf32, #tpu.memory_space<vmem>>, vector<4x256xf32>
    %cst_84 = arith.constant 0.000000e+00 : f32
    %103 = vector.broadcast %cst_84 : f32 to vector<4x256xf32>
    %104 = vector.shape_cast %20 : vector<1x256xi1> to vector<1x256xi1>
    %105 = vector.broadcast %104 : vector<1x256xi1> to vector<4x256xi1>
    %106 = arith.select %105, %102, %103 : vector<4x256xi1>, vector<4x256xf32>
    %c0_85 = arith.constant 0 : index
    %c32_86 = arith.constant 32 : index
    %107 = vector.load %arg7[%c0_85, %c32_86] : memref<4x290xf32, #tpu.memory_space<vmem>>, vector<4x256xf32>
    %cst_87 = arith.constant 0.000000e+00 : f32
    %108 = vector.broadcast %cst_87 : f32 to vector<4x256xf32>
    %109 = vector.shape_cast %18 : vector<1x256xi1> to vector<1x256xi1>
    %110 = vector.broadcast %109 : vector<1x256xi1> to vector<4x256xi1>
    %111 = arith.select %110, %107, %108 : vector<4x256xi1>, vector<4x256xf32>
    %c0_88 = arith.constant 0 : index
    %c33_89 = arith.constant 33 : index
    %112 = vector.load %arg7[%c0_88, %c33_89] : memref<4x290xf32, #tpu.memory_space<vmem>>, vector<4x256xf32>
    %c0_90 = arith.constant 0 : index
    %c34_91 = arith.constant 34 : index
    %113 = vector.load %arg7[%c0_90, %c34_91] : memref<4x290xf32, #tpu.memory_space<vmem>>, vector<4x256xf32>
    %cst_92 = arith.constant 0.000000e+00 : f32
    %114 = vector.broadcast %cst_92 : f32 to vector<4x256xf32>
    %115 = vector.shape_cast %20 : vector<1x256xi1> to vector<1x256xi1>
    %116 = vector.broadcast %115 : vector<1x256xi1> to vector<4x256xi1>
    %117 = arith.select %116, %113, %114 : vector<4x256xi1>, vector<4x256xf32>
    %118 = tpu.concatenate %89, %90, %95, %100, %101, %106, %111, %112, %117, %21 in 0 : vector<4x256xf32>, vector<4x256xf32>, vector<4x256xf32>, vector<4x256xf32>, vector<4x256xf32>, vector<4x256xf32>, vector<4x256xf32>, vector<4x256xf32>, vector<4x256xf32>, vector<1x256xf32> -> vector<37x256xf32>
    %c0_93 = arith.constant 0 : index
    %c0_94 = arith.constant 0 : index
    %119 = vector.load %arg5[%c0_93, %c0_94] : memref<4x37xf32, #tpu.memory_space<vmem>>, vector<4x37xf32>
    %cst_95 = arith.constant dense<0.000000e+00> : vector<4x256xf32>
    %120 = tpu.matmul %119, %118, %cst_95 {dimension_numbers = #tpu.dot_dimension_numbers<[1], [0], [0], [1], [0, 0, 1, 1], [], []>} : vector<4x37xf32>, vector<37x256xf32>, vector<4x256xf32> -> vector<4x256xf32>
    %121 = arith.addf %120, %75 : vector<4x256xf32>
    %c1_96 = arith.constant 1 : index
    %c0_97 = arith.constant 0 : index
    %c0_98 = arith.constant 0 : index
    %c0_99 = arith.constant 0 : index
    %122 = vector.load %arg6[%c1_96, %c0_97, %c0_98, %c0_99] : memref<2x1x4x256xf32, #tpu.memory_space<vmem>>, vector<1x1x4x256xf32>
    %123 = vector.shape_cast %122 : vector<1x1x4x256xf32> to vector<4x256xf32>
    %124 = vector.shape_cast %121 : vector<4x256xf32> to vector<1x1x4x256xf32>
    tpu.vector_store %arg6[%c1_96, %c0_97, %c0_98, %c0_99], %124 {strides = array<i32>} : memref<2x1x4x256xf32, #tpu.memory_space<vmem>>, vector<1x1x4x256xf32>,
    return
  }
  func.func @transform_0(%arg0: i32, %arg1: i32) -> (i32, i32, i32, i32) {
    %c0_i32 = arith.constant 0 : i32
    %c0_i32_0 = arith.constant 0 : i32
    %c0_i32_1 = arith.constant 0 : i32
    return %arg0, %arg1, %c0_i32, %c0_i32_0 : i32, i32, i32, i32
  }
  func.func @transform_1(%arg0: i32, %arg1: i32) -> (i32, i32, i32, i32) {
    %c0_i32 = arith.constant 0 : i32
    %c0_i32_0 = arith.constant 0 : i32
    %c0_i32_1 = arith.constant 0 : i32
    return %arg0, %arg1, %c0_i32, %c0_i32_0 : i32, i32, i32, i32
  }
  func.func @transform_2(%arg0: i32, %arg1: i32) -> (i32, i32, i32, i32) {
    %c0_i32 = arith.constant 0 : i32
    %c0_i32_0 = arith.constant 0 : i32
    %c0_i32_1 = arith.constant 0 : i32
    return %arg0, %arg1, %c0_i32, %c0_i32_0 : i32, i32, i32, i32
  }
  func.func @transform_3(%arg0: i32, %arg1: i32) -> (i32, i32) {
    %c0_i32 = arith.constant 0 : i32
    %c0_i32_0 = arith.constant 0 : i32
    %c0_i32_1 = arith.constant 0 : i32
    return %c0_i32, %c0_i32_0 : i32, i32
  }
  func.func @transform_4(%arg0: i32, %arg1: i32) -> (i32, i32, i32, i32) {
    %c0_i32 = arith.constant 0 : i32
    %c0_i32_0 = arith.constant 0 : i32
    %c0_i32_1 = arith.constant 0 : i32
    return %arg0, %arg1, %c0_i32, %c0_i32_0 : i32, i32, i32, i32
  }
}

</mosaic_0001>

<bundles_post_ra>
// kernel: tpu_custom_call.1
= control target key start
LH: loop header
LB: loop body
LE: loop exit
PB: predicated region body
PF: predicated region fallthrough
CT: control target
= control target key end

     0   :  { %9 = vsyncpa [#allocation4], 0  ;;  %s1201_s0 = inlined_call_operand.hbm [shape: f32[2,1,4,256], index: 0, kind: input, shape index: {}]   ;;  %s1202_s1 = inlined_call_operand.hbm [shape: f32[2,1,4,16], index: 1, kind: input, shape index: {}]   ;;  %s1203_s2 = inlined_call_operand.hbm [shape: f32[2,1,4,16], index: 2, kind: input, shape index: {}]   ;;  %s1204_s3 = inlined_call_operand.vmem [shape: f32[4,37], index: 3, kind: input, shape index: {}]   ;;  %s1205_s4 = inlined_call_operand.hbm [shape: f32[2,1,4,256], index: 4, kind: output, shape index: {}]  }
   0x1   :  { %10 = vsyncpa [#allocation7], 0 }
   0x2   :  { %11 = vsyncpa [#allocation5], 0  ;;  %s851_s15 = smov [#allocation6]   ;;  %s757_s19 = scalar_lea.hbm %s1202_s1, 128 }
   0x3   :  { %s29_s16 = sshll.u32 %s851_s15, 4  ;;  %p758_p0 = scmp.ne.s32.totalorder %s1202_s1, %s757_s19  ;;  %s30_s16 = int_to_ptr.vmem [resolvable:$true] %s29_s16 }
   0x4   :  { %p761_p1 = scmp.lt.u32.totalorder %s757_s19, %s1202_s1 }
   0x6   :  { %p763_p2 = pnand %p761_p1, %p758_p0 }
   0x8   :  { %766 = shalt.err (!%p763_p2)
}
   0x9   :  { %s767_s24 = scalar_lea.vmem %s30_s16, 128  ;;  %p772_p4 = scmp.lt.s32.totalorder %s30_s16, %s30_s16 }
   0xa   :  { %p768_p3 = scmp.ne.s32.totalorder %s30_s16, %s767_s24  ;;  %p773_p5 = scmp.lt.s32.totalorder %s767_s24, %s767_s24 }
   0xc   :  { %p774_p6 = por %p773_p5, %p772_p4 }
   0xe   :  { %p775_p7 = pnand %p774_p6, %p768_p3 }
  0x10   :  { %778 = shalt.err (!%p775_p7)
}
  0x11   :  { %s852_s25 = smov 64   ;;  %s853_s26 = smov 4  }
  0x12   :  { %35 = dma.hbm_to_vmem [thread:$0]  %s1202_s1, 128, %s30_s16, [#allocation7], %s852_s25, %s852_s25, %s853_s26  }
  0x13   :  { %s854_s29 = smov [#allocation3]   ;;  %s779_s7 = scalar_lea.hbm %s1201_s0, 256 }
  0x14   :  { %s17_s30 = sshll.u32 %s854_s29, 4  ;;  %p780_p8 = scmp.ne.s32.totalorder %s1201_s0, %s779_s7  ;;  %s18_s30 = int_to_ptr.vmem [resolvable:$true] %s17_s30 }
  0x15   :  { %p783_p9 = scmp.lt.u32.totalorder %s779_s7, %s1201_s0 }
  0x17   :  { %p785_p10 = pnand %p783_p9, %p780_p8 }
  0x19   :  { %788 = shalt.err (!%p785_p10)
}
  0x1a   :  { %s789_s12 = scalar_lea.vmem %s18_s30, 256  ;;  %p794_p12 = scmp.lt.s32.totalorder %s18_s30, %s18_s30 }
  0x1b   :  { %p790_p11 = scmp.ne.s32.totalorder %s18_s30, %s789_s12  ;;  %p795_p13 = scmp.lt.s32.totalorder %s789_s12, %s789_s12 }
  0x1d   :  { %p796_p0 = por %p795_p13, %p794_p12 }
  0x1f   :  { %p797_p1 = pnand %p796_p0, %p790_p11 }
  0x21   :  { %800 = shalt.err (!%p797_p1)
}
  0x22   :  { %s855_s1 = smov 128   ;;  %s856_s13 = smov 8  }
  0x23   :  { %23 = dma.hbm_to_vmem [thread:$0]  %s1201_s0, 256, %s18_s30, [#allocation4], %s855_s1, %s855_s1, %s856_s13  }
  0x24   :  { %s857_s16 = smov [#allocation8]   ;;  %s801_s20 = scalar_lea.hbm %s1203_s2, 128 }
  0x25   :  { %s41_s17 = sshll.u32 %s857_s16, 4  ;;  %p802_p2 = scmp.ne.s32.totalorder %s1203_s2, %s801_s20  ;;  %s42_s17 = int_to_ptr.vmem [resolvable:$true] %s41_s17 }
  0x26   :  { %p805_p3 = scmp.lt.u32.totalorder %s801_s20, %s1203_s2 }
  0x28   :  { %p807_p4 = pnand %p805_p3, %p802_p2 }
  0x2a   :  { %810 = shalt.err (!%p807_p4)
}
  0x2b   :  { %s811_s27 = scalar_lea.vmem %s42_s17, 128  ;;  %p816_p6 = scmp.lt.s32.totalorder %s42_s17, %s42_s17 }
  0x2c   :  { %p812_p5 = scmp.ne.s32.totalorder %s42_s17, %s811_s27  ;;  %p817_p7 = scmp.lt.s32.totalorder %s811_s27, %s811_s27 }
  0x2e   :  { %p818_p8 = por %p817_p7, %p816_p6 }
  0x30   :  { %p819_p9 = pnand %p818_p8, %p812_p5 }
  0x32   :  { %822 = shalt.err (!%p819_p9)
}
  0x33   :  { %47 = dma.hbm_to_vmem [thread:$0]  %s1203_s2, 128, %s42_s17, [#allocation7], %s852_s25, %s852_s25, %s853_s26  }
  0x34   :  { %845 = dma.done.wait [#allocation4], 256  }
  0x35   :  { %846 = vsyncadd [#allocation4], 4294967040 }
  0x36   :  { %847 = dma.done.wait [#allocation7], 256  }
  0x37   :  { %848 = vsyncadd [#allocation7], 4294967040  ;;  %vm91_vm0 = vcmask 3072   ;;  %v858_v0 = vmov 0.0   ;;  %v941_v1 = vld [vmem:[#allocation3] sm:$0xff]  ;;  %s859_s29 = smov 17   ;;  %v59_v34 = vlaneseq }
  0x38   :  { %92 = vst.msk [vmem:[#allocation2] sm:$0xf] %vm91_vm0, %v858_v0  ;;  %340 = vmatprep.mubr.f32.mxu0 %v858_v0  ;;  %577 = vmatprep.mubr.f32.mxu1 %v858_v0  ;;  %v114_v2 = vld [vmem:[#allocation8] sm:$0xf]  ;;  %v93_v3 = vld [vmem:[#allocation6] sm:$0xf] }
  0x39   :  { %101 = vrot.lane.b32.xlu0 %v941_v1, %s859_s29  ;;  %116 = vrot.lane.b32.xlu1 %v114_v2, %s859_s29  ;;  %v944_v4 = vld [vmem:[#allocation3 + $0x8] sm:$0xff]  ;;  %s860_s2 = smov 1   ;;  %v372_v5 = vld [vmem:[#allocation8 + $0x4] sm:$0xf]  ;;  %v356_v6 = vld [vmem:[#allocation6 + $0x4] sm:$0xf] }
  0x3a   :  { %vm112_vm1 = vcmask 134144   ;;  %vm108_vm2 = vcmask 1043592   ;;  %vm109_vm3 = vcmask 1047556   ;;  %vm119_vm4 = vcmask 265352   ;;  %s861_s25 = smov 126   ;;  %s862_s26 = smov 112  }
  0x3b   :  { %vm104_vm5 = vcmask 138240   ;;  %vm121_vm6 = vcmask 273672   ;;  %vm98_vm7 = vcmask 134152   ;;  %vm948_vm8 = vmor %vm109_vm3, %vm108_vm2  ;;  %s863_s30 = smov 111   ;;  %s864_s5 = smov 110   ;;  %v60_v35 = vand.u32 127, %v59_v34 }
  0x3c   :  { %s865_s6 = smov 96   ;;  %s866_s7 = smov 127   ;;  %vm158_vm9 = vcmask 916480   ;;  %vm145_vm11 = vcmask 1031168   ;;  %vm212_vm13 = vcmask 1039360   ;;  %vm251_vm14 = vcmask 1043456  }
  0x3d   :  { %95 = vrot.lane.b32.xlu0 %v93_v3, %s860_s2  ;;  %363 = vrot.lane.b32.xlu1 %v944_v4, %s859_s29  ;;  %s867_s8 = smov 95   ;;  %s868_s9 = smov 94   ;;  %v61_v38 = vadd.s32 128, %v60_v35  ;;  %vm171_vm15 = vcmask 900096   ;;  %vm246_vm3 = vcmask 777216  }
  0x3f   :  { %v73_v43 = vand.u32 15, %v61_v38 }
  0x41   :  { %374 = vrot.lane.b32.xlu1 %v372_v5, %s859_s29  ;;  %358 = vrot.lane.b32.xlu0 %v356_v6, %s860_s2  ;;  %vm1009_vm10 = vcmp.ge.s32.totalorder %v73_v43, 1  ;;  %vm1015_vm12 = vcmp.lt.s32.totalorder %v73_v43, 15  ;;  %v66_v5 = vand.u32 15, %v60_v35 }
  0x43   :  { %vm1041_vm2 = vcmp.lt.s32.totalorder %v66_v5, 15 }
  0xab   :  { %v102_v7 = vpop.permute.xlu0 %101  ;;  %v117_v9 = vpop.permute.xlu1 %116 }
  0xac   :  { %v103_v8 = vrot.slane %v102_v7, 4 }
  0xae   :  { %113 = vst.msk [vmem:[#allocation2 + $0x8] sm:$0xf] %vm112_vm1, %v103_v8  ;;  %v105_v12 = vsel %vm104_vm5, %v103_v8, %v102_v7 }
  0xaf   :  { %120 = vst.msk [vmem:[#allocation2 + $0x8] sm:$0xf] %vm119_vm4, %v117_v9  ;;  %v96_v11 = vpop.permute.xlu0 %95  ;;  %v364_v13 = vpop.permute.xlu1 %363 }
  0xb0   :  { %122 = vst.msk [vmem:[#allocation2 + $0x8] sm:$0xf] %vm121_vm6, %v858_v0  ;;  %v365_v14 = vrot.slane %v364_v13, 4 }
  0xb1   :  { %99 = vst.msk [vmem:[#allocation2] sm:$0xf] %vm98_vm7, %v96_v11 }
  0xb2   :  { %111 = vst.msk [vmem:[#allocation2] sm:$0xff] %vm948_vm8, %v105_v12  ;;  %v366_v19 = vsel %vm104_vm5, %v365_v14, %v364_v13  ;;  %vm197_vm5 = vcmask 769024  }
  0xb3   :  { %v375_v15 = vpop.permute.xlu1 %374  ;;  %v359_v17 = vpop.permute.xlu0 %358 }
  0xb7   :  { %v133_v16 = vld [vmem:[#allocation2 + $0x8] sm:$0xf] }
  0xb8   :  { %370 = vst.msk [vmem:[#allocation2 + $0x8] sm:$0xf] %vm112_vm1, %v365_v14  ;;  %v205_v24 = vcombine.low %v133_v16, %v133_v16  ;;  %vm229_vm1 = vcmask 908288  }
  0xb9   :  { %v958_v18 = vld [vmem:[#allocation2] sm:$0xff]  ;;  %377 = vst.msk [vmem:[#allocation2 + $0x8] sm:$0xf] %vm119_vm4, %v375_v15  ;;  %vm1045_vm4 = vcmp.ge.s32.totalorder %v66_v5, 1 }
  0xba   :  { %354 = vst.msk [vmem:[#allocation2] sm:$0xf] %vm91_vm0, %v858_v0  ;;  %v966_v20 = vcombine.high %v958_v18, %v958_v18  ;;  %v674_v25 = vpack.i.bf16 %v205_v24, %v958_v18  ;;  %v204_v30 = vcombine.low %v958_v18, %v958_v18  ;;  %vm184_vm0 = vcmask 785408  }
  0xbb   :  { %378 = vst.msk [vmem:[#allocation2 + $0x8] sm:$0xf] %vm121_vm6, %v858_v0  ;;  %v131_v38 = vsel %vm1045_vm4, %v958_v18, 0.0  ;;  %vm269_vm6 = vcmask 1044480  }
  0xbc   :  { %361 = vst.msk [vmem:[#allocation2] sm:$0xf] %vm98_vm7, %v359_v17  ;;  %v654_v21 = vpack.i.bf16 %v133_v16, %v966_v20  ;;  %v132_v60 = vsel %vm1009_vm10, %v966_v20, 0.0  ;;  %vm265_vm7 = vcmask 302080   ;;  %v502_v17 = vcombine.high %v944_v4, %v944_v4 }
  0xbd   :  { %369 = vst.msk [vmem:[#allocation2] sm:$0xff] %vm948_vm8, %v366_v19 }
  0xbe   :  { %655 = vrot.lane.b32.xlu1 %v654_v21, %s861_s25  ;;  %650 = vrot.lane.b32.xlu0 %v654_v21, %s862_s26 }
  0xc2   :  { %670 = vrot.lane.b32.xlu1 %v654_v21, %s863_s30  ;;  %660 = vrot.lane.b32.xlu0 %v654_v21, %s864_s5  ;;  %v385_v27 = vld [vmem:[#allocation2 + $0x8] sm:$0xf] }
  0xc3   :  { %v448_v32 = vcombine.low %v385_v27, %v385_v27 }
  0xc4   :  { %v975_v22 = vld [vmem:[#allocation2] sm:$0xff] }
  0xc5   :  { %v689_v23 = vpack.i.bf16 %v975_v22, %v958_v18  ;;  %v983_v26 = vcombine.high %v975_v22, %v975_v22  ;;  %v447_v29 = vcombine.low %v975_v22, %v975_v22  ;;  %v744_v33 = vpack.i.bf16 %v448_v32, %v975_v22 }
  0xc6   :  { %665 = vrot.lane.b32.xlu0 %v654_v21, %s865_s6 }
  0xc7   :  { %690 = vrot.lane.b32.xlu1 %v689_v23, %s861_s25  ;;  %v709_v28 = vpack.i.bf16 %v385_v27, %v983_v26  ;;  %v719_v31 = vpack.i.bf16 %v447_v29, %v204_v30 }
  0xca   :  { %675 = vrot.lane.b32.xlu0 %v674_v25, %s866_s7 }
  0xcb   :  { %695 = vrot.lane.b32.xlu1 %v689_v23, %s864_s5 }
  0xce   :  { %680 = vrot.lane.b32.xlu0 %v674_v25, %s867_s8 }
  0xcf   :  { %705 = vrot.lane.b32.xlu1 %v689_v23, %s863_s30 }
  0xd2   :  { %685 = vrot.lane.b32.xlu0 %v689_v23, %s862_s26 }
  0xd3   :  { %710 = vrot.lane.b32.xlu1 %v709_v28, %s862_s26 }
  0xd6   :  { %700 = vrot.lane.b32.xlu0 %v689_v23, %s865_s6 }
  0xd7   :  { %720 = vrot.lane.b32.xlu1 %v719_v31, %s866_s7 }
  0xda   :  { %715 = vrot.lane.b32.xlu0 %v709_v28, %s861_s25 }
  0xdb   :  { %730 = vrot.lane.b32.xlu1 %v709_v28, %s865_s6 }
  0xde   :  { %725 = vrot.lane.b32.xlu0 %v709_v28, %s864_s5 }
  0xdf   :  { %735 = vrot.lane.b32.xlu1 %v709_v28, %s863_s30 }
  0xe2   :  { %740 = vrot.lane.b32.xlu0 %v719_v31, %s867_s8 }
  0xe3   :  { %745 = vrot.lane.b32.xlu1 %v744_v33, %s866_s7 }
  0xe6   :  { %195 = vrot.lane.b32.xlu0 %v133_v16, %s868_s9 }
  0xe7   :  { %193 = vrot.lane.b32.xlu1 %v966_v20, %s868_s9 }
  0xea   :  { %750 = vrot.lane.b32.xlu0 %v744_v33, %s867_s8 }
  0xeb   :  { %437 = vrot.lane.b32.xlu1 %v983_v26, %s868_s9 }
  0xee   :  { %439 = vrot.lane.b32.xlu0 %v385_v27, %s868_s9 }
  0xef   :  { %191 = vrot.lane.b32.xlu1 %v958_v18, %s868_s9 }
  0xf2   :  { %435 = vrot.lane.b32.xlu0 %v975_v22, %s868_s9 }
 0x130   :  { %v998_v36 = vpop.permute.xlu1 %655  ;;  %v651_v37 = vpop.permute.xlu0 %650 }
 0x131   :  { %v653_v39 = vunpack.i.h.bf16 %v651_v37  ;;  %v652_v40 = vunpack.i.l.bf16 %v651_v37  ;;  %v658_v47 = vunpack.i.h.bf16 %v998_v36  ;;  %v657_v48 = vunpack.i.l.bf16 %v998_v36 }
 0x133   :  { %v160_v44 = vsel %vm158_vm9, %v652_v40, %v653_v39  ;;  %v147_v56 = vsel %vm145_vm11, %v657_v48, %v658_v47 }
 0x134   :  { %v1000_v41 = vpop.permute.xlu1 %670  ;;  %v661_v42 = vpop.permute.xlu0 %660  ;;  %v164_v50 = vsel %vm1009_vm10, %v160_v44, 0.0  ;;  %v151_v0 = vsel %vm1015_vm12, %v147_v56, 0.0 }
 0x135   :  { %v220_v57 = vrot.slane %v164_v50, 4  ;;  %v663_v58 = vunpack.i.h.bf16 %v661_v42  ;;  %v662_v59 = vunpack.i.l.bf16 %v661_v42  ;;  %v673_v20 = vunpack.i.h.bf16 %v1000_v41 }
 0x136   :  { %v672_v21 = vunpack.i.l.bf16 %v1000_v41 }
 0x137   :  { %v255_v3 = vsel %vm251_vm14, %v151_v0, %v220_v57  ;;  %v173_v7 = vsel %vm171_vm15, %v662_v59, %v663_v58 }
 0x138   :  { %v1005_v46 = vpop.permute.xlu0 %665  ;;  %v177_v23 = vsel %vm1015_vm12, %v173_v7, 0.0 }
 0x139   :  { %v1003_v45 = vpop.permute.xlu1 %690  ;;  %v668_v9 = vunpack.i.h.bf16 %v1005_v46  ;;  %v667_v10 = vunpack.i.l.bf16 %v1005_v46  ;;  %v237_v36 = vrot.slane %v177_v23, 4 }
 0x13a   :  { %v692_v8 = vunpack.i.l.bf16 %v1003_v45  ;;  %v693_v0 = vunpack.i.h.bf16 %v1003_v45 }
 0x13b   :  { %v186_v25 = vsel %vm184_vm0, %v667_v10, %v668_v9 }
 0x13c   :  { %v676_v53 = vpop.permute.xlu0 %675  ;;  %v146_v30 = vsel %vm145_vm11, %v692_v8, %v657_v48  ;;  %v190_v43 = vsel %vm1009_vm10, %v186_v25, 0.0 }
 0x13d   :  { %v1019_v52 = vpop.permute.xlu1 %695  ;;  %v678_v54 = vunpack.i.h.bf16 %v676_v53  ;;  %v677_v55 = vunpack.i.l.bf16 %v676_v53  ;;  %v150_v41 = vsel %vm1041_vm2, %v146_v30, 0.0 }
 0x13e   :  { %v697_v11 = vunpack.i.l.bf16 %v1019_v52 }
 0x13f   :  { %v214_v61 = vsel %vm212_vm13, %v677_v55, %v678_v54  ;;  %v231_v54 = vsel %vm229_vm1, %v672_v21, %v673_v20 }
 0x140   :  { %v1028_v63 = vpop.permute.xlu0 %680  ;;  %v253_v2 = vsel %vm251_vm14, %v132_v60, %v214_v61  ;;  %v172_v27 = vsel %vm171_vm15, %v697_v11, %v662_v59  ;;  %v257_v61 = vsel %vm251_vm14, %v231_v54, %v237_v36  ;;  %v383_v11 = vsel %vm1045_vm4, %v975_v22, 0.0 }
 0x141   :  { %v1026_v62 = vpop.permute.xlu1 %705  ;;  %v614_v6 = vpack.c.bf16 %v255_v3, %v253_v2  ;;  %v683_v14 = vunpack.i.h.bf16 %v1028_v63  ;;  %v682_v15 = vunpack.i.l.bf16 %v1028_v63 }
 0x142   :  { %v707_v44 = vunpack.i.l.bf16 %v1026_v62 }
 0x143   :  { %615 = vmatprep.subr.bf16.mxu0 %v614_v6  ;;  %v248_v32 = vsel %vm246_vm3, %v682_v15, %v683_v14 }
 0x144   :  { %v686_v13 = vpop.permute.xlu0 %685  ;;  %v259_v53 = vsel %vm251_vm14, %v190_v43, %v248_v32  ;;  %v230_v5 = vsel %vm229_vm1, %v707_v44, %v672_v21  ;;  %v384_v21 = vsel %vm1009_vm10, %v983_v26, 0.0 }
 0x145   :  { %v711_v12 = vpop.permute.xlu1 %710  ;;  %v687_v16 = vunpack.i.l.bf16 %v686_v13  ;;  %v688_v37 = vunpack.i.h.bf16 %v686_v13  ;;  %v618_v3 = vpack.c.bf16 %v259_v53, %v257_v61 }
 0x146   :  { %v713_v33 = vunpack.i.h.bf16 %v711_v12  ;;  %v712_v34 = vunpack.i.l.bf16 %v711_v12 }
 0x147   :  { %v159_v24 = vsel %vm158_vm9, %v687_v16, %v652_v40  ;;  %v176_v40 = vsel %vm1041_vm2, %v172_v27, 0.0  ;;  %v698_v16 = vunpack.i.h.bf16 %v1019_v52 }
 0x148   :  { %v1060_v29 = vpop.permute.xlu0 %700  ;;  %v163_v31 = vsel %vm1045_vm4, %v159_v24, 0.0  ;;  %v406_v56 = vsel %vm158_vm9, %v712_v34, %v713_v33  ;;  %v405_v58 = vsel %vm158_vm9, %v688_v37, %v712_v34  ;;  %v236_v2 = vrot.slane %v176_v40, 4 }
 0x149   :  { %v1058_v28 = vpop.permute.xlu1 %720  ;;  %v219_v39 = vrot.slane %v163_v31, 4  ;;  %v702_v59 = vunpack.i.l.bf16 %v1060_v29  ;;  %v410_v9 = vsel %vm1009_vm10, %v406_v56, 0.0  ;;  %v409_v14 = vsel %vm1045_vm4, %v405_v58, 0.0 }
 0x14a   :  { %v722_v35 = vunpack.i.l.bf16 %v1058_v28  ;;  %v723_v22 = vunpack.i.h.bf16 %v1058_v28  ;;  %v703_v23 = vunpack.i.h.bf16 %v1060_v29  ;;  %v256_v24 = vsel %vm251_vm14, %v230_v5, %v236_v2 }
 0x14b   :  { %v254_v18 = vsel %vm251_vm14, %v150_v41, %v219_v39  ;;  %v185_v20 = vsel %vm184_vm0, %v702_v59, %v667_v10  ;;  %v462_v30 = vrot.slane %v410_v9, 4  ;;  %v461_v31 = vrot.slane %v409_v14, 4 }
 0x14c   :  { %v213_v42 = vsel %vm212_vm13, %v722_v35, %v677_v55  ;;  %v716_v48 = vpop.permute.xlu0 %715  ;;  %v189_v29 = vsel %vm1045_vm4, %v185_v20, 0.0 }
 0x14d   :  { %v1080_v47 = vpop.permute.xlu1 %730  ;;  %v252_v50 = vsel %vm251_vm14, %v131_v38, %v213_v42  ;;  %v718_v57 = vunpack.i.h.bf16 %v716_v48  ;;  %v717_v55 = vunpack.i.l.bf16 %v716_v48 }
 0x14e   :  { %v616_v60 = vpack.c.bf16 %v254_v18, %v252_v50  ;;  %v733_v33 = vunpack.i.h.bf16 %v1080_v47  ;;  %v732_v34 = vunpack.i.l.bf16 %v1080_v47 }
 0x14f   :  { %v394_v8 = vsel %vm145_vm11, %v717_v55, %v718_v57  ;;  %v393_v45 = vsel %vm145_vm11, %v693_v0, %v717_v55 }
 0x150   :  { %617 = vmatpush1.bf16.msra.mxu0 %v616_v60  ;;  %v726_v7 = vpop.permute.xlu0 %725  ;;  %v398_v25 = vsel %vm1015_vm12, %v394_v8, 0.0  ;;  %v397_v10 = vsel %vm1041_vm2, %v393_v45, 0.0  ;;  %v429_v56 = vsel %vm184_vm0, %v703_v23, %v732_v34 }
 0x151   :  { %v1092_v6 = vpop.permute.xlu1 %735  ;;  %v728_v12 = vunpack.i.h.bf16 %v726_v7  ;;  %v727_v13 = vunpack.i.l.bf16 %v726_v7  ;;  %619 = vmatprep.subr.bf16.mxu0 %v618_v3  ;;  %v494_v36 = vsel %vm251_vm14, %v398_v25, %v462_v30  ;;  %v493_v40 = vsel %vm251_vm14, %v397_v10, %v461_v31 }
 0x152   :  { %v738_v55 = vunpack.i.h.bf16 %v1092_v6  ;;  %v737_v58 = vunpack.i.l.bf16 %v1092_v6  ;;  %v708_v3 = vunpack.i.h.bf16 %v1026_v62  ;;  %v433_v6 = vsel %vm1045_vm4, %v429_v56, 0.0 }
 0x153   :  { %v417_v52 = vsel %vm171_vm15, %v698_v16, %v727_v13  ;;  %v418_v26 = vsel %vm171_vm15, %v727_v13, %v728_v12 }
 0x154   :  { %v741_v46 = vpop.permute.xlu0 %740  ;;  %v421_v37 = vsel %vm1041_vm2, %v417_v52, 0.0  ;;  %v422_v41 = vsel %vm1015_vm12, %v418_v26, 0.0  ;;  %v472_v12 = vsel %vm229_vm1, %v737_v58, %v738_v55  ;;  %v501_v26 = vld [vmem:[%s1204_s3] sm:$0xf] }
 0x155   :  { %v746_v27 = vpop.permute.xlu1 %745  ;;  %v742_v35 = vunpack.i.l.bf16 %v741_v46  ;;  %v477_v60 = vrot.slane %v421_v37, 4  ;;  %v478_v61 = vrot.slane %v422_v41, 4  ;;  %v743_v5 = vunpack.i.h.bf16 %v741_v46 }
 0x156   :  { %v748_v32 = vunpack.i.h.bf16 %v746_v27  ;;  %v747_v28 = vunpack.i.l.bf16 %v746_v27  ;;  %v262_v27 = vld [vmem:[%s1204_s3] sm:$0xf]  ;;  %s869_s3 = smov [#allocation9]  }
 0x157   :  { %v247_v42 = vsel %vm246_vm3, %v742_v35, %v682_v15  ;;  %v430_v15 = vsel %vm184_vm0, %v732_v34, %v733_v33  ;;  %v496_v16 = vsel %vm251_vm14, %v472_v12, %v478_v61  ;;  %s595_s15 = sshll.u32 %s869_s3, 4  ;;  %s596_s15 = int_to_ptr.vmem [resolvable:$true] %s595_s15 }
 0x158   :  { %v456_v38 = vsel %vm212_vm13, %v747_v28, %v748_v32  ;;  %v455_v39 = vsel %vm212_vm13, %v723_v22, %v747_v28  ;;  %v196_v44 = vpop.permute.xlu0 %195  ;;  %v258_v18 = vsel %vm251_vm14, %v189_v29, %v247_v42  ;;  %v434_v9 = vsel %vm1009_vm10, %v430_v15, 0.0  ;;  %s823_s16 = scalar_lea.vmem %s596_s15, 256  ;;  %p828_p11 = scmp.lt.s32.totalorder %s596_s15, %s596_s15 }
 0x159   :  { %v194_v43 = vpop.permute.xlu1 %193  ;;  %v492_v47 = vsel %vm251_vm14, %v384_v21, %v456_v38  ;;  %v491_v48 = vsel %vm251_vm14, %v383_v11, %v455_v39  ;;  %v620_v63 = vpack.c.bf16 %v258_v18, %v256_v24  ;;  %v471_v11 = vsel %vm229_vm1, %v708_v3, %v737_v58  ;;  %p824_p10 = scmp.ne.s32.totalorder %s596_s15, %s823_s16  ;;  %p829_p12 = scmp.lt.s32.totalorder %s823_s16, %s823_s16 }
 0x15a   :  { %v199_v50 = vsel %vm197_vm5, %v194_v43, %v196_v44  ;;  %v622_v53 = vpack.c.bf16 %v494_v36, %v492_v47  ;;  %v624_v54 = vpack.c.bf16 %v493_v40, %v491_v48  ;;  %v495_v49 = vsel %vm251_vm14, %v471_v11, %v477_v60 }
 0x15b   :  { %v203_v57 = vsel %vm1015_vm12, %v199_v50, 0.0  ;;  %621 = vmatpush1.bf16.msra.mxu0 %v620_v63  ;;  %v263_v28 = vcombine.high %v941_v1, %v941_v1  ;;  %p830_p13 = por %p829_p12, %p828_p11 }
 0x15c   :  { %623 = vmatprep.subr.bf16.mxu1 %v622_v53  ;;  %v261_v59 = vsel %vm251_vm14, %v203_v57, 1.0  ;;  %v751_v2 = vpop.permute.xlu0 %750 }
 0x15d   :  { %v438_v0 = vpop.permute.xlu1 %437  ;;  %625 = vmatpush1.bf16.msra.mxu1 %v624_v54  ;;  %v753_v7 = vunpack.i.h.bf16 %v751_v2  ;;  %v752_v8 = vunpack.i.l.bf16 %v751_v2  ;;  %608 = vmatprep.subr.msk.mxu0 %vm269_vm6, %v261_v59  ;;  %p831_p0 = pnand %p830_p13, %p824_p10 }
 0x15f   :  { %v487_v13 = vsel %vm246_vm3, %v743_v5, %v752_v8  ;;  %v488_v45 = vsel %vm246_vm3, %v752_v8, %v753_v7 }
 0x160   :  { %v440_v14 = vpop.permute.xlu0 %439  ;;  %v498_v20 = vsel %vm251_vm14, %v434_v9, %v488_v45  ;;  %v497_v21 = vsel %vm251_vm14, %v433_v6, %v487_v13 }
 0x161   :  { %v192_v62 = vpop.permute.xlu1 %191  ;;  %v442_v22 = vsel %vm197_vm5, %v438_v0, %v440_v14  ;;  %v626_v23 = vpack.c.bf16 %v498_v20, %v496_v16  ;;  %v628_v24 = vpack.c.bf16 %v497_v21, %v495_v49 }
 0x162   :  { %v198_v19 = vsel %vm197_vm5, %v192_v62, %v194_v43  ;;  %v446_v52 = vsel %vm1015_vm12, %v442_v22, 0.0 }
 0x163   :  { %v202_v25 = vsel %vm1041_vm2, %v198_v19, 0.0  ;;  %627 = vmatprep.subr.bf16.mxu1 %v626_v23  ;;  %v500_v30 = vsel %vm251_vm14, %v446_v52, 1.0 }
 0x164   :  { %v260_v46 = vsel %vm251_vm14, %v202_v25, 1.0  ;;  %v436_v10 = vpop.permute.xlu0 %435  ;;  %629 = vmatpush1.bf16.msra.mxu1 %v628_v24 }
 0x165   :  { %609 = vmatpush1.msk.msra.mxu0 %vm269_vm6, %v260_v46  ;;  %v441_v31 = vsel %vm197_vm5, %v436_v10, %v438_v0  ;;  %611 = vmatprep.subr.msk.mxu1 %vm269_vm6, %v500_v30 }
 0x166   :  { %610 = vmatmul.mubr.msk.f32.vlgmr.msra.gmra.mrb[0].mxu0 %vm265_vm7, %v262_v27  ;;  %v445_v51 = vsel %vm1041_vm2, %v441_v31, 0.0 }
 0x167   :  { %v499_v32 = vsel %vm251_vm14, %v445_v51, 1.0 }
 0x168   :  { %612 = vmatpush1.msk.msra.mxu1 %vm269_vm6, %v499_v32 }
 0x169   :  { %613 = vmatmul.mubr.msk.f32.vlgmr.msra.gmra.mrb[0].mxu1 %vm265_vm7, %v501_v26 }
 0x239   :  { %v342_v29 = vpop.f32.mrb[0].mxu0 }
 0x23a   :  { %v343_v33 = vadd.f32 %v342_v29, %v941_v1  ;;  %v344_v34 = vpop.f32.mrb[1].mxu0 }
 0x23b   :  { %v345_v35 = vadd.f32 %v344_v34, %v263_v28 }
 0x23c   :  { %v579_v37 = vpop.f32.mrb[0].mxu1 }
 0x23d   :  { %v349_v36 = vcombine.low %v343_v33, %v345_v35  ;;  %v580_v38 = vadd.f32 %v579_v37, %v944_v4  ;;  %v581_v39 = vpop.f32.mrb[1].mxu1 }
 0x23e   :  { %v582_v40 = vadd.f32 %v581_v39, %v502_v17 }
 0x23f   :  { %351 = vst [vmem:[#allocation9] sm:$0xff] %v349_v36 }
 0x240   :  { %v586_v41 = vcombine.low %v580_v38, %v582_v40 }
 0x242   :  { %589 = vst [vmem:[#allocation9 + $0x8] sm:$0xff] %v586_v41 }
 0x243   :  { %834 = shalt.err (!%p831_p0)
}
 0x244   :  { %s835_s19 = scalar_lea.hbm %s1205_s4, 256 }
 0x245   :  { %p836_p1 = scmp.ne.s32.totalorder %s1205_s4, %s835_s19  ;;  %p839_p2 = scmp.lt.u32.totalorder %s835_s19, %s1205_s4 }
 0x247   :  { %p841_p3 = pnand %p839_p2, %p836_p1 }
 0x249   :  { %844 = shalt.err (!%p841_p3)
}
 0x24a   :  { %601 = dma.vmem_to_hbm [thread:$0]  %s596_s15, 256, %s1205_s4, [#allocation5], %s855_s1, %s855_s1, %s856_s13  }
 0x24b   :  { %849 = dma.done.wait [#allocation5], 256  }
 0x24c   :  { %850 = vsyncadd [#allocation5], 4294967040 }
 0x24d   :  { %605 = vsyncpa [#allocation4], 1 }
 0x24e   :  { %606 = vsyncpa [#allocation7], 1 }
 0x24f   :  { %607 = vsyncpa [#allocation5], 1 }

</bundles_post_ra>
